<compile_context>
chip_gen: v7x
topology: tpu7x:2x2x1
jax: 0.10.0
libtpu: 0.0.40
codegen_flags: <defaults>
</compile_context>

<pallas_src>
import jax
import jax.numpy as jnp
from jax.experimental import pallas as pl
from jax.experimental.pallas import tpu as pltpu


def _round_up(x, m):
    return -(-x // m) * m


def _triblock_kernel(a_ref, b_ref, w_ref, bias_ref, o_ref, gate_ref):
    """One (tm, tn) output tile of (silu(a) * b) @ W.T + bias.

    Grid = (m, n); the contraction dim K (= hidden) is un-tiled, so each output
    tile is produced in a single MXU pass (no accumulator round-trip).
    gate_ref is a (tm, K) bf16 VMEM cache of silu(a)*b for the current m tile,
    computed only at n == 0 and re-used for every weight panel.
    """
    @pl.when(pl.program_id(1) == 0)
    def _compute_gate():
        # Gate math in f32 (v5e has no bf16 VPU/EUP); bf16 feed to the MXU.
        a = a_ref[...].astype(jnp.float32)
        b = b_ref[...].astype(jnp.float32)
        gate_ref[...] = (a * jax.nn.sigmoid(a) * b).astype(jnp.bfloat16)

    acc = jnp.dot(gate_ref[...], w_ref[...], preferred_element_type=jnp.float32)
    o_ref[...] = (acc + bias_ref[...].astype(jnp.float32)).astype(o_ref.dtype)


def _pick_tn(hidden):
    # Lane-dense output tiles (multiple of 128); 256 fills the v6e/v7x MXU width.
    for cand in (256, 128):
        if hidden % cand == 0 and hidden >= cand:
            return cand
    return hidden  # full extent (hidden < 128 or not a multiple of 128)


def _pick_tm(tokens):
    # Keep the MXU fed: never let tm collapse to 8 for awkward token counts;
    # pad the token dim up to a multiple of tm instead.
    if tokens <= 256:
        return max(16, _round_up(tokens, 16))  # single m tile, minimal padding
    for cand in (256, 128, 64):
        if _round_up(tokens, cand) - tokens <= max(cand // 2, tokens // 8):
            return cand
    return 64


def _vmem_bytes(tm, tn, k, out_bytes):
    return (2 * 2 * tm * k * 2          # a, b bf16 tiles, double-buffered
            + 2 * k * tn * 2            # bf16 weight panel, double-buffered
            + 2 * 8 * tn * 4            # f32 bias slice (sublane-padded), x2
            + 2 * tm * tn * out_bytes   # output tile, double-buffered
            + tm * k * 2                # bf16 gate cache (scratch)
            + 2 * tm * k * 4)           # headroom for f32 elementwise temporaries


def _vmem_budget_bytes():
    cap = 64 << 20  # conservative default: v7x per-TensorCore VMEM
    try:
        cap = int(pltpu.get_tpu_info().vmem_capacity_bytes)
    except Exception:  # older/newer jax or interpret-mode tracing
        pass
    return min((3 * cap) // 4, 96 << 20)


def triblock_gated_linear(a, b, w, bias):
    """Fused (silu(a) * b) @ W.T + bias.

    a, b : [..., H] activations (outputs of block_a(x) / block_b(x))
    w    : [H, H]   nn.Linear weight, PyTorch layout [out, in]
    bias : [H]
    """
    orig_shape = a.shape
    hidden = orig_shape[-1]
    out_dtype = a.dtype

    # Activations travel HBM->VMEM as bf16 (under jit this cast fuses with the
    # producing op); the gate itself is computed in f32 inside the kernel.
    a2 = a.reshape(-1, hidden).astype(jnp.bfloat16)
    b2 = b.reshape(-1, hidden).astype(jnp.bfloat16)
    tokens = a2.shape[0]

    tn = _pick_tn(hidden)
    tm = _pick_tm(tokens)

    # Shrink tiles until the working set fits the per-TensorCore VMEM budget
    # (v7x: 64 MiB; v5e/v6e: 128 MiB).
    out_bytes = jnp.dtype(out_dtype).itemsize
    budget = _vmem_budget_bytes()
    while _vmem_bytes(tm, tn, hidden, out_bytes) > budget and tm > 16:
        tm = max(16, tm // 2)
    while (_vmem_bytes(tm, tn, hidden, out_bytes) > budget
           and tn % 256 == 0 and hidden % (tn // 2) == 0):
        tn //= 2
    # TODO(synk): for hidden dims so large that even (tm=16, tn=128) full-K tiles
    # exceed VMEM, a K-tiled variant with an f32 accumulator would be needed.

    tokens_p = _round_up(tokens, tm)
    if tokens_p != tokens:
        a2 = jnp.pad(a2, ((0, tokens_p - tokens), (0, 0)))
        b2 = jnp.pad(b2, ((0, tokens_p - tokens), (0, 0)))

    # [out, in] -> [in, out] bf16 so the kernel computes x @ w_t.  Under jit with
    # a fixed weight this transpose+cast is hoisted/folded by XLA; in a training
    # loop keep the weight pre-transposed outside the step function.
    w_t = jnp.asarray(w, jnp.bfloat16).T
    bias2 = jnp.asarray(bias, jnp.float32).reshape(1, hidden)

    grid = (tokens_p // tm, hidden // tn)
    est = _vmem_bytes(tm, tn, hidden, out_bytes)
    vmem_limit = min(budget, max(32 << 20, est + (8 << 20)))

    out = pl.pallas_call(
        _triblock_kernel,
        out_shape=jax.ShapeDtypeStruct((tokens_p, hidden), out_dtype),
        grid_spec=pltpu.PrefetchScalarGridSpec(
            num_scalar_prefetch=0,
            grid=grid,
            in_specs=[
                pl.BlockSpec((tm, hidden), lambda m, n: (m, 0)),   # a  (per-m)
                pl.BlockSpec((tm, hidden), lambda m, n: (m, 0)),   # b  (per-m)
                pl.BlockSpec((hidden, tn), lambda m, n: (0, n)),   # weight panel
                pl.BlockSpec((1, tn), lambda m, n: (0, n)),        # bias slice
            ],
            out_specs=pl.BlockSpec((tm, tn), lambda m, n: (m, n)),
            scratch_shapes=[pltpu.VMEM((tm, hidden), jnp.bfloat16)],
        ),
        compiler_params=pltpu.CompilerParams(
            # m tiles are independent -> megacore / v7x dual-TC sharding; n must
            # stay ordered because the gate cache is written at n == 0.
            dimension_semantics=("parallel", "arbitrary"),
            vmem_limit_bytes=vmem_limit,
        ),
    )(a2, b2, w_t, bias2)

    if tokens_p != tokens:
        out = out[:tokens]
    return out.reshape(orig_shape[:-1] + (hidden,))


def triblock_forward(x, w, bias):
    """TriBlock.forward: w(silu(block_a(x)) * block_b(x))."""
    # TODO(synk): FlatBlock not provided -> block_a / block_b are identity here.
    a = x  # block_a(x)
    b = x  # block_b(x)
    return triblock_gated_linear(a, b, w, bias)


if __name__ == "__main__":
    batch, seq, dim = 2, 8, 128          # lane-dense hidden dim (multiple of 128)
    key = jax.random.PRNGKey(0)
    kx, kw, kb = jax.random.split(key, 3)

    x = jax.random.normal(kx, (batch, seq, dim), dtype=jnp.float32)
    # nn.Linear(dim, dim): weight [out, in] and bias ~ U(-1/sqrt(dim), 1/sqrt(dim))
    bound = 1.0 / (dim ** 0.5)
    w = jax.random.uniform(kw, (dim, dim), jnp.float32, -bound, bound)
    bias = jax.random.uniform(kb, (dim,), jnp.float32, -bound, bound)

    fwd = jax.jit(triblock_forward)
    out = jax.block_until_ready(fwd(x, w, bias))

    # f32 reference of the same (identity-FlatBlock) forward pass.
    gated = jax.nn.silu(x) * x
    ref = jnp.einsum("bsh,oh->bso", gated, w) + bias

    assert out.shape == x.shape
    # bf16 activations / MXU operands with f32 accumulation.
    assert jnp.allclose(out, ref, atol=2e-2, rtol=2e-2), float(
        jnp.max(jnp.abs(out - ref)))

    print("KERNEL_OK")
</pallas_src>

<mosaic_0001>
module attributes {stable_mosaic.version = 11 : i64} {
  func.func @_triblock_kernel(%arg0: i32, %arg1: i32, %arg2: memref<16x128xbf16, #tpu.memory_space<vmem>>, %arg3: memref<16x128xbf16, #tpu.memory_space<vmem>>, %arg4: memref<128x128xbf16, #tpu.memory_space<vmem>>, %arg5: memref<1x128xf32, #tpu.memory_space<vmem>>, %arg6: memref<16x128xf32, #tpu.memory_space<vmem>>, %arg7: memref<16x128xbf16, #tpu.memory_space<vmem>>) attributes {dimension_semantics = [#tpu.dimension_semantics<parallel>, #tpu.dimension_semantics<arbitrary>], iteration_bounds = array<i64: 1, 1>, scalar_prefetch = 0 : i64, scratch_operands = 1 : i64, tpu.core_type = #tpu.core_type<tc>, window_params = [{transform_indices = @transform_0, window_bounds = array<i64: 16, 128>}, {transform_indices = @transform_1, window_bounds = array<i64: 16, 128>}, {transform_indices = @transform_2, window_bounds = array<i64: 128, 128>}, {transform_indices = @transform_3, window_bounds = array<i64: 1, 128>}, {transform_indices = @transform_4, window_bounds = array<i64: 16, 128>}]} {
    %c0_i32 = arith.constant 0 : i32
    %0 = arith.cmpi eq, %arg1, %c0_i32 : i32
    %1 = arith.extui %0 : i1 to i32
    %c0_i32_0 = arith.constant 0 : i32
    %2 = arith.cmpi ne, %1, %c0_i32_0 : i32
    scf.if %2 {
      %c0_8 = arith.constant 0 : index
      %c0_9 = arith.constant 0 : index
      %10 = vector.load %arg2[%c0_8, %c0_9] : memref<16x128xbf16, #tpu.memory_space<vmem>>, vector<16x128xbf16>
      %11 = arith.extf %10 : vector<16x128xbf16> to vector<16x128xf32>
      %c0_10 = arith.constant 0 : index
      %c0_11 = arith.constant 0 : index
      %12 = vector.load %arg3[%c0_10, %c0_11] : memref<16x128xbf16, #tpu.memory_space<vmem>>, vector<16x128xbf16>
      %13 = arith.extf %12 : vector<16x128xbf16> to vector<16x128xf32>
      %14 = arith.negf %11 : vector<16x128xf32>
      %15 = math.exp %14 : vector<16x128xf32>
      %cst_12 = arith.constant 1.000000e+00 : f32
      %16 = vector.broadcast %cst_12 : f32 to vector<16x128xf32>
      %17 = arith.addf %16, %15 : vector<16x128xf32>
      %18 = arith.divf %16, %17 : vector<16x128xf32>
      %19 = arith.mulf %11, %18 : vector<16x128xf32>
      %20 = arith.mulf %19, %13 : vector<16x128xf32>
      %21 = arith.truncf %20 : vector<16x128xf32> to vector<16x128xbf16>
      %c0_13 = arith.constant 0 : index
      %c0_14 = arith.constant 0 : index
      %22 = vector.load %arg7[%c0_13, %c0_14] : memref<16x128xbf16, #tpu.memory_space<vmem>>, vector<16x128xbf16>
      tpu.vector_store %arg7[%c0_13, %c0_14], %21 {strides = array<i32>} : memref<16x128xbf16, #tpu.memory_space<vmem>>, vector<16x128xbf16>,
    } else {
    }
    %c0 = arith.constant 0 : index
    %c0_1 = arith.constant 0 : index
    %3 = vector.load %arg7[%c0, %c0_1] : memref<16x128xbf16, #tpu.memory_space<vmem>>, vector<16x128xbf16>
    %c0_2 = arith.constant 0 : index
    %c0_3 = arith.constant 0 : index
    %4 = vector.load %arg4[%c0_2, %c0_3] : memref<128x128xbf16, #tpu.memory_space<vmem>>, vector<128x128xbf16>
    %cst = arith.constant dense<0.000000e+00> : vector<16x128xf32>
    %5 = tpu.matmul %3, %4, %cst {dimension_numbers = #tpu.dot_dimension_numbers<[1], [0], [0], [1], [0, 0, 1, 1], [], []>} : vector<16x128xbf16>, vector<128x128xbf16>, vector<16x128xf32> -> vector<16x128xf32>
    %c0_4 = arith.constant 0 : index
    %c0_5 = arith.constant 0 : index
    %6 = vector.load %arg5[%c0_4, %c0_5] : memref<1x128xf32, #tpu.memory_space<vmem>>, vector<1x128xf32>
    %7 = vector.broadcast %6 : vector<1x128xf32> to vector<16x128xf32>
    %8 = arith.addf %5, %7 : vector<16x128xf32>
    %c0_6 = arith.constant 0 : index
    %c0_7 = arith.constant 0 : index
    %9 = vector.load %arg6[%c0_6, %c0_7] : memref<16x128xf32, #tpu.memory_space<vmem>>, vector<16x128xf32>
    tpu.vector_store %arg6[%c0_6, %c0_7], %8 {strides = array<i32>} : memref<16x128xf32, #tpu.memory_space<vmem>>, vector<16x128xf32>,
    return
  }
  func.func @transform_0(%arg0: i32, %arg1: i32) -> (i32, i32) {
    %c0_i32 = arith.constant 0 : i32
    %c0_i32_0 = arith.constant 0 : i32
    return %arg0, %c0_i32 : i32, i32
  }
  func.func @transform_1(%arg0: i32, %arg1: i32) -> (i32, i32) {
    %c0_i32 = arith.constant 0 : i32
    %c0_i32_0 = arith.constant 0 : i32
    return %arg0, %c0_i32 : i32, i32
  }
  func.func @transform_2(%arg0: i32, %arg1: i32) -> (i32, i32) {
    %c0_i32 = arith.constant 0 : i32
    %c0_i32_0 = arith.constant 0 : i32
    return %c0_i32, %arg1 : i32, i32
  }
  func.func @transform_3(%arg0: i32, %arg1: i32) -> (i32, i32) {
    %c0_i32 = arith.constant 0 : i32
    %c0_i32_0 = arith.constant 0 : i32
    return %c0_i32, %arg1 : i32, i32
  }
  func.func @transform_4(%arg0: i32, %arg1: i32) -> (i32, i32) {
    %c0_i32 = arith.constant 0 : i32
    return %arg0, %arg1 : i32, i32
  }
}

</mosaic_0001>

<bundles_post_ra>
// kernel: triblock_forward.1
= control target key start
LH: loop header
LB: loop body
LE: loop exit
PB: predicated region body
PF: predicated region fallthrough
CT: control target
= control target key end

     0   :  { %v273_v1 = vmov 0.0   ;;  %vm274_vm0 = vmmov 0   ;;  %s348_s0 = inlined_call_operand.vmem [shape: bf16[16,128], index: 0, kind: input, shape index: {}, may-alias: {0,1}]   ;;  %s349_s1 = inlined_call_operand.vmem [shape: bf16[16,128], index: 1, kind: input, shape index: {}, may-alias: {0,1}]   ;;  %s350_s2 = inlined_call_operand.vmem [shape: bf16[128,128], index: 2, kind: input, shape index: {}]   ;;  %s351_s3 = inlined_call_operand.vmem [shape: f32[1,128], index: 3, kind: input, shape index: {}]   ;;  %s352_s4 = inlined_call_operand.hbm [shape: f32[16,128], index: 4, kind: output, shape index: {}]  }
   0x1   :  { %v233_v0 = vld [vmem:[%s350_s2] sm:$0xff]   ;;  %208 = vmatprep.subr.bf16.mxu0 %v273_v1  ;;  %v234_v2 = vld [vmem:[%s350_s2 + $0x8] sm:$0xff]   ;;  %224 = vmatprep.mubr.msk.bf16.mxu0 %vm274_vm0, %v273_v1  ;;  %v235_v3 = vld [vmem:[%s350_s2 + $0x10] sm:$0xff]  }
   0x2   :  { %209 = vmatpush3.bf16.msra.mxu0 %v233_v0  ;;  %v192_v4 = vld [vmem:[%s348_s0] sm:$0xff]  }
   0x3   :  { %210 = vmatprep.subr.bf16.mxu0 %v273_v1  ;;  %v193_v5 = vunpack.c.l.bf16 %v192_v4  ;;  %v194_v6 = vunpack.c.h.bf16 %v192_v4 }
   0x6   :  { %211 = vmatpush3.bf16.msra.mxu0 %v234_v2 }
   0x7   :  { %212 = vmatprep.subr.bf16.mxu0 %v273_v1 }
   0x8   :  { %9 = vsyncpa [#allocation4], 0  ;;  %v236_v7 = vld [vmem:[%s350_s2 + $0x18] sm:$0xff]   ;;  %v180_v8 = vmul.f32 -1.442695, %v193_v5  ;;  %v237_v10 = vld [vmem:[%s350_s2 + $0x20] sm:$0xff]  }
   0x9   :  { %v181_v9 = vmul.f32 -1.442695, %v194_v6  ;;  %v238_v11 = vld [vmem:[%s350_s2 + $0x28] sm:$0xff]   ;;  %v239_v12 = vld [vmem:[%s350_s2 + $0x30] sm:$0xff]   ;;  %v240_v17 = vld [vmem:[%s350_s2 + $0x38] sm:$0xff]   ;;  %s275_s9 = smov [#allocation3]  }
   0xa   :  { %213 = vmatpush3.bf16.msra.mxu0 %v235_v3  ;;  %241 = vpow2.f32 %v180_v8  ;;  %v196_v18 = vld [vmem:[%s349_s1] sm:$0xff]   ;;  %s169_s10 = sshll.u32 %s275_s9, 4  ;;  %s170_s10 = int_to_ptr.vmem [resolvable:$true] %s169_s10 }
   0xb   :  { %214 = vmatprep.subr.bf16.mxu0 %v273_v1  ;;  %243 = vpow2.f32 %v181_v9  ;;  %v197_v19 = vunpack.c.l.bf16 %v196_v18  ;;  %v198_v21 = vunpack.c.h.bf16 %v196_v18  ;;  %v182_v28 = vld [vmem:[%s351_s3] ss:$0 sm:$0xff]  ;;  %s249_s1 = scalar_lea.vmem %s170_s10, 256  ;;  %p254_p1 = scmp.lt.s32.totalorder %s170_s10, %s170_s10 }
   0xc   :  { %p250_p0 = scmp.ne.s32.totalorder %s170_s10, %s249_s1  ;;  %p255_p2 = scmp.lt.s32.totalorder %s249_s1, %s249_s1 }
   0xe   :  { %215 = vmatpush3.bf16.msra.mxu0 %v236_v7  ;;  %p256_p3 = por %p255_p2, %p254_p1 }
   0xf   :  { %216 = vmatprep.subr.bf16.mxu0 %v273_v1 }
  0x10   :  { %p257_p4 = pnand %p256_p3, %p250_p0 }
  0x12   :  { %217 = vmatpush3.bf16.msra.mxu0 %v237_v10 }
  0x13   :  { %218 = vmatprep.subr.bf16.mxu0 %v273_v1 }
  0x14   :  { %v242_v13 = vpop.eup %241 }
  0x15   :  { %v244_v14 = vpop.eup %243  ;;  %v37_v15 = vadd.f32 1.0, %v242_v13 }
  0x16   :  { %219 = vmatpush3.bf16.msra.mxu0 %v238_v11  ;;  %v38_v16 = vadd.f32 1.0, %v244_v14 }
  0x17   :  { %220 = vmatprep.subr.bf16.mxu0 %v273_v1  ;;  %245 = vrcp.f32 %v37_v15 }
  0x18   :  { %247 = vrcp.f32 %v38_v16 }
  0x1a   :  { %221 = vmatpush3.bf16.msra.mxu0 %v239_v12 }
  0x1b   :  { %222 = vmatprep.subr.bf16.mxu0 %v273_v1 }
  0x1e   :  { %223 = vmatpush3.bf16.msra.mxu0 %v240_v17 }
  0x21   :  { %v246_v20 = vpop.eup %245 }
  0x22   :  { %v248_v22 = vpop.eup %247  ;;  %v43_v23 = vmul.f32 %v246_v20, %v193_v5 }
  0x23   :  { %v44_v24 = vmul.f32 %v248_v22, %v194_v6 }
  0x24   :  { %v45_v25 = vmul.f32 %v197_v19, %v43_v23 }
  0x25   :  { %v46_v26 = vmul.f32 %v198_v21, %v44_v24 }
  0x27   :  { %v47_v27 = vpack.c.bf16 %v46_v26, %v45_v25 }
  0x29   :  { %225 = vmatmul.mubr.bf16.vlgmr.msra.gmra.mrb[0].mxu0 %v47_v27 }
  0xfc   :  { %v155_v29 = vpop.f32.mrb[0].mxu0 }
  0xfd   :  { %v156_v30 = vadd.f32 %v182_v28, %v155_v29  ;;  %v226_v31 = vpop.f32.mrb[1].mxu0 }
  0xfe   :  { %v158_v32 = vpop.f32.mrb[2].mxu0 }
  0xff   :  { %162 = vst [vmem:[#allocation3] sm:$0xff] %v156_v30  ;;  %v159_v33 = vadd.f32 %v182_v28, %v158_v32  ;;  %v227_v34 = vpop.f32.mrb[3].mxu0 }
 0x101   :  { %163 = vst [vmem:[#allocation3 + $0x8] sm:$0xff] %v159_v33 }
 0x102   :  { %260 = shalt.err (!%p257_p4)
}
 0x103   :  { %s261_s12 = scalar_lea.hbm %s352_s4, 256 }
 0x104   :  { %p262_p5 = scmp.ne.s32.totalorder %s352_s4, %s261_s12  ;;  %p265_p6 = scmp.lt.u32.totalorder %s261_s12, %s352_s4 }
 0x106   :  { %p267_p7 = pnand %p265_p6, %p262_p5 }
 0x108   :  { %270 = shalt.err (!%p267_p7)
}
 0x109   :  { %s276_s17 = smov 128   ;;  %s277_s18 = smov 8  }
 0x10a   :  { %175 = dma.vmem_to_hbm [thread:$0]  %s170_s10, 256, %s352_s4, [#allocation4], %s276_s17, %s276_s17, %s277_s18  }
 0x10b   :  { %271 = dma.done.wait [#allocation4], 256  }
 0x10c   :  { %272 = vsyncadd [#allocation4], 4294967040 }
 0x10d   :  { %179 = vsyncpa [#allocation4], 1 }

</bundles_post_ra>
